<compile_context>
chip_gen: v5e
topology: v5e:2x2
jax: 0.10.0
libtpu: 0.0.40
codegen_flags: <defaults>
</compile_context>

<pallas_src>
import functools

import jax
import jax.numpy as jnp
from jax.experimental import pallas as pl
from jax.experimental.pallas import tpu as pltpu


def _round_up(x, m):
    return (x + m - 1) // m * m


def _vmem_capacity_bytes(default=64 << 20):
    try:
        info = pltpu.get_tpu_info()
        cap = getattr(info, "vmem_capacity_bytes", None)
        if cap:
            return int(cap)
    except Exception:
        pass
    return default


def simple_head_kernel(vis_ref, wv_ref, bv_ref, txt_ref, wt_ref, bt_ref,
                       v_out_ref, t_out_ref, *, inv_hw):
    # AdaptiveAvgPool2d((1,1)) == spatial mean.  NCHW block (bB, C, HW):
    # reduce over the lane (HW) axis with an f32 accumulator (no materialized
    # f32 copy of the whole slab); the 1/(H*W) scale is folded into the
    # (bB, E) matmul result, which is strictly fewer VALU ops.
    pooled = jnp.sum(vis_ref[...], axis=-1, dtype=jnp.float32)        # (bB, C)

    # visual_embed_layer: Linear(visual_size -> embed_size).  Weights were
    # pre-cast once in the wrapper, so VMEM-resident tiles are used as-is.
    v = jnp.dot(pooled, wv_ref[...], preferred_element_type=jnp.float32)
    v_out_ref[...] = (v * inv_hw + bv_ref[...]).astype(v_out_ref.dtype)

    # textual_embed_layer: Linear(textual_size -> embed_size)
    t = jnp.dot(txt_ref[...].astype(jnp.float32), wt_ref[...],
                preferred_element_type=jnp.float32)
    t_out_ref[...] = (t + bt_ref[...]).astype(t_out_ref.dtype)


def simple_head_forward(visual_feature, textual_feature, wv, bv, wt, bt,
                        *, batch_block=None):
    """visual_feature: (B, C, H, W) NCHW; textual_feature: (B, T).

    wv: (visual_size, E), wt: (textual_size, E)  (pre-transposed nn.Linear
    weights), bv/bt: (E,).
    Returns [visual_embed (B, E), textual_embed (B, E)].
    """
    B, C, H, W = visual_feature.shape
    HW = H * W
    vis = visual_feature.reshape(B, C, HW)       # free reshape, NO transpose
    txt = textual_feature.reshape(B, -1)
    T = txt.shape[1]
    E = wv.shape[1]
    E_pad = _round_up(E, 128)

    out_dtype = jnp.result_type(visual_feature.dtype, textual_feature.dtype,
                                wv.dtype, wt.dtype)

    # Weights/biases: cast once here (tiny vs the visual slab) so the kernel
    # never re-casts its resident tiles; pad E to a lane-dense multiple of 128.
    wv_f = wv.astype(jnp.float32)
    wt_f = wt.astype(jnp.float32)
    bv_f = bv.astype(jnp.float32).reshape(1, E)
    bt_f = bt.astype(jnp.float32).reshape(1, E)
    if E_pad > E:
        wv_f = jnp.pad(wv_f, ((0, 0), (0, E_pad - E)))
        wt_f = jnp.pad(wt_f, ((0, 0), (0, E_pad - E)))
        bv_f = jnp.pad(bv_f, ((0, 0), (0, E_pad - E)))
        bt_f = jnp.pad(bt_f, ((0, 0), (0, E_pad - E)))

    # ---- batch tiling (generation-aware, no padding of the visual slab) ----
    itemsize = jnp.dtype(vis.dtype).itemsize
    per_row_bytes = max(1, HW * C * itemsize)
    vmem_cap = _vmem_capacity_bytes()
    vmem_limit = int(min(vmem_cap * 3 // 4, 96 << 20))   # 48 MiB on v7x, 96 MiB v5e/v6e
    resident_bytes = 2 * (C + T + 2) * E_pad * 4         # f32 weights/biases (x2 buf)
    if batch_block is None:
        slab_budget = (vmem_limit - resident_bytes - (8 << 20)) // 2
        slab_budget = max(2 << 20, min(24 << 20, slab_budget))
        bB = max(8, (slab_budget // per_row_bytes) // 8 * 8)
    else:
        bB = max(8, _round_up(batch_block, 8))
    # Keep >= 4 grid steps when B allows it: feeds the double-buffered DMA
    # pipeline and lets "parallel" shard the batch axis across both v7x TCs.
    bB = min(bB, max(8, _round_up(pl.cdiv(B, 4), 8)))
    if bB >= B:
        bB = B          # single full block; block dim == full array dim is legal
    n_blocks = pl.cdiv(B, bB)
    # No jnp.pad of `vis`: a ragged last block reads past the array edge (batch
    # rows are independent) and Pallas drops the out-of-range output rows.

    in_specs = [
        # visual slab: tiled over batch, pipelined (dominant HBM traffic)
        pl.BlockSpec((bB, C, HW), lambda i: (i, 0, 0)),
        # weights / biases: constant index_map -> resident in VMEM
        pl.BlockSpec((C, E_pad), lambda i: (0, 0)),
        pl.BlockSpec((1, E_pad), lambda i: (0, 0)),
        # textual features: tiled over the same batch grid
        pl.BlockSpec((bB, T), lambda i: (i, 0)),
        pl.BlockSpec((T, E_pad), lambda i: (0, 0)),
        pl.BlockSpec((1, E_pad), lambda i: (0, 0)),
    ]
    out_specs = (
        pl.BlockSpec((bB, E_pad), lambda i: (i, 0)),
        pl.BlockSpec((bB, E_pad), lambda i: (i, 0)),
    )

    out_itemsize = jnp.dtype(out_dtype).itemsize
    cost = pl.CostEstimate(
        flops=2 * B * C * E_pad + 2 * B * T * E_pad + B * C * HW,
        transcendentals=0,
        bytes_accessed=(B * HW * C * itemsize
                        + B * T * jnp.dtype(txt.dtype).itemsize
                        + (C + T + 2) * E_pad * 4
                        + 2 * B * E_pad * out_itemsize),
    )

    v_embed, t_embed = pl.pallas_call(
        functools.partial(simple_head_kernel, inv_hw=1.0 / float(HW)),
        out_shape=(
            jax.ShapeDtypeStruct((B, E_pad), out_dtype),
            jax.ShapeDtypeStruct((B, E_pad), out_dtype),
        ),
        grid_spec=pltpu.PrefetchScalarGridSpec(
            num_scalar_prefetch=0,
            grid=(n_blocks,),
            in_specs=in_specs,
            out_specs=out_specs,
        ),
        compiler_params=pltpu.CompilerParams(
            # batch axis is embarrassingly parallel -> megacore sharding (v7x)
            dimension_semantics=("parallel",),
            vmem_limit_bytes=vmem_limit,
        ),
        cost_estimate=cost,
    )(vis, wv_f, bv_f, txt, wt_f, bt_f)

    return [v_embed[:, :E], t_embed[:, :E]]


def init_params(key, visual_size, textual_size, embed_size):
    """kaiming_normal_(mode='fan_out', a=0) on Linear weights, zero bias.

    PyTorch weight shape is (out, in); fan_out = out = embed_size,
    std = sqrt(2 / fan_out). We store the transpose (in, out) for the kernel.
    """
    k1, k2 = jax.random.split(key)
    std = (2.0 / embed_size) ** 0.5
    wv = jax.random.normal(k1, (visual_size, embed_size), jnp.float32) * std
    wt = jax.random.normal(k2, (textual_size, embed_size), jnp.float32) * std
    bv = jnp.zeros((embed_size,), jnp.float32)
    bt = jnp.zeros((embed_size,), jnp.float32)
    return wv, bv, wt, bt


if __name__ == "__main__":
    key = jax.random.PRNGKey(0)
    k_vis, k_txt, k_par = jax.random.split(key, 3)

    B, C, H, W = 2, 4, 16, 16        # visual NCHW
    T = 8                            # textual feature size
    E = 32                           # cfg.MODEL.EMBEDDING.FEATURE_SIZE

    visual_feature = jax.random.normal(k_vis, (B, C, H, W), jnp.float32)
    textual_feature = jax.random.normal(k_txt, (B, T), jnp.float32)
    wv, bv, wt, bt = init_params(k_par, visual_size=C, textual_size=T,
                                 embed_size=E)

    outputs = simple_head_forward(visual_feature, textual_feature,
                                  wv, bv, wt, bt)
    jax.block_until_ready(outputs)

    # correctness check against plain-JAX reference
    pooled_ref = visual_feature.mean(axis=(2, 3))
    v_ref = pooled_ref @ wv + bv
    t_ref = textual_feature @ wt + bt
    assert jnp.allclose(outputs[0], v_ref, atol=1e-4, rtol=1e-4)
    assert jnp.allclose(outputs[1], t_ref, atol=1e-4, rtol=1e-4)

    print("KERNEL_OK")
</pallas_src>

<mosaic_0001>
module attributes {stable_mosaic.version = 11 : i64} {
  func.func @simple_head_kernel(%arg0: i32, %arg1: memref<2x4x256xf32, #tpu.memory_space<vmem>>, %arg2: memref<4x128xf32, #tpu.memory_space<vmem>>, %arg3: memref<1x128xf32, #tpu.memory_space<vmem>>, %arg4: memref<2x8xf32, #tpu.memory_space<vmem>>, %arg5: memref<8x128xf32, #tpu.memory_space<vmem>>, %arg6: memref<1x128xf32, #tpu.memory_space<vmem>>, %arg7: memref<2x128xf32, #tpu.memory_space<vmem>>, %arg8: memref<2x128xf32, #tpu.memory_space<vmem>>) attributes {dimension_semantics = [#tpu.dimension_semantics<parallel>], iteration_bounds = array<i64: 1>, scalar_prefetch = 0 : i64, scratch_operands = 0 : i64, tpu.core_type = #tpu.core_type<tc>, window_params = [{transform_indices = @transform_0, window_bounds = array<i64: 2, 4, 256>}, {pipeline_mode = #tpu.pipeline_mode<synchronous>, transform_indices = @transform_1, window_bounds = array<i64: 4, 128>}, {pipeline_mode = #tpu.pipeline_mode<synchronous>, transform_indices = @transform_2, window_bounds = array<i64: 1, 128>}, {transform_indices = @transform_3, window_bounds = array<i64: 2, 8>}, {pipeline_mode = #tpu.pipeline_mode<synchronous>, transform_indices = @transform_4, window_bounds = array<i64: 8, 128>}, {pipeline_mode = #tpu.pipeline_mode<synchronous>, transform_indices = @transform_5, window_bounds = array<i64: 1, 128>}, {transform_indices = @transform_6, window_bounds = array<i64: 2, 128>}, {transform_indices = @transform_7, window_bounds = array<i64: 2, 128>}]} {
    %c0 = arith.constant 0 : index
    %c0_0 = arith.constant 0 : index
    %c0_1 = arith.constant 0 : index
    %0 = vector.load %arg1[%c0, %c0_0, %c0_1] : memref<2x4x256xf32, #tpu.memory_space<vmem>>, vector<2x4x256xf32>
    %cst = arith.constant dense<0.000000e+00> : vector<2x4xf32>
    %1 = vector.multi_reduction <add>, %0, %cst [2] : vector<2x4x256xf32> to vector<2x4xf32>
    %c0_2 = arith.constant 0 : index
    %c0_3 = arith.constant 0 : index
    %2 = vector.load %arg2[%c0_2, %c0_3] : memref<4x128xf32, #tpu.memory_space<vmem>>, vector<4x128xf32>
    %cst_4 = arith.constant dense<0.000000e+00> : vector<2x128xf32>
    %3 = tpu.matmul %1, %2, %cst_4 {dimension_numbers = #tpu.dot_dimension_numbers<[1], [0], [0], [1], [0, 0, 1, 1], [], []>} : vector<2x4xf32>, vector<4x128xf32>, vector<2x128xf32> -> vector<2x128xf32>
    %cst_5 = arith.constant 3.906250e-03 : f32
    %4 = vector.broadcast %cst_5 : f32 to vector<2x128xf32>
    %5 = arith.mulf %3, %4 : vector<2x128xf32>
    %c0_6 = arith.constant 0 : index
    %c0_7 = arith.constant 0 : index
    %6 = vector.load %arg3[%c0_6, %c0_7] : memref<1x128xf32, #tpu.memory_space<vmem>>, vector<1x128xf32>
    %7 = vector.broadcast %6 : vector<1x128xf32> to vector<2x128xf32>
    %8 = arith.addf %5, %7 : vector<2x128xf32>
    %c0_8 = arith.constant 0 : index
    %c0_9 = arith.constant 0 : index
    %9 = vector.load %arg7[%c0_8, %c0_9] : memref<2x128xf32, #tpu.memory_space<vmem>>, vector<2x128xf32>
    tpu.vector_store %arg7[%c0_8, %c0_9], %8 {strides = array<i32>} : memref<2x128xf32, #tpu.memory_space<vmem>>, vector<2x128xf32>,
    %c0_10 = arith.constant 0 : index
    %c0_11 = arith.constant 0 : index
    %10 = vector.load %arg4[%c0_10, %c0_11] : memref<2x8xf32, #tpu.memory_space<vmem>>, vector<2x8xf32>
    %c0_12 = arith.constant 0 : index
    %c0_13 = arith.constant 0 : index
    %11 = vector.load %arg5[%c0_12, %c0_13] : memref<8x128xf32, #tpu.memory_space<vmem>>, vector<8x128xf32>
    %cst_14 = arith.constant dense<0.000000e+00> : vector<2x128xf32>
    %12 = tpu.matmul %10, %11, %cst_14 {dimension_numbers = #tpu.dot_dimension_numbers<[1], [0], [0], [1], [0, 0, 1, 1], [], []>} : vector<2x8xf32>, vector<8x128xf32>, vector<2x128xf32> -> vector<2x128xf32>
    %c0_15 = arith.constant 0 : index
    %c0_16 = arith.constant 0 : index
    %13 = vector.load %arg6[%c0_15, %c0_16] : memref<1x128xf32, #tpu.memory_space<vmem>>, vector<1x128xf32>
    %14 = vector.broadcast %13 : vector<1x128xf32> to vector<2x128xf32>
    %15 = arith.addf %12, %14 : vector<2x128xf32>
    %c0_17 = arith.constant 0 : index
    %c0_18 = arith.constant 0 : index
    %16 = vector.load %arg8[%c0_17, %c0_18] : memref<2x128xf32, #tpu.memory_space<vmem>>, vector<2x128xf32>
    tpu.vector_store %arg8[%c0_17, %c0_18], %15 {strides = array<i32>} : memref<2x128xf32, #tpu.memory_space<vmem>>, vector<2x128xf32>,
    return
  }
  func.func @transform_0(%arg0: i32) -> (i32, i32, i32) {
    %c0_i32 = arith.constant 0 : i32
    %c0_i32_0 = arith.constant 0 : i32
    %c0_i32_1 = arith.constant 0 : i32
    return %arg0, %c0_i32, %c0_i32_0 : i32, i32, i32
  }
  func.func @transform_1(%arg0: i32) -> (i32, i32) {
    %c0_i32 = arith.constant 0 : i32
    %c0_i32_0 = arith.constant 0 : i32
    %c0_i32_1 = arith.constant 0 : i32
    return %c0_i32, %c0_i32_0 : i32, i32
  }
  func.func @transform_2(%arg0: i32) -> (i32, i32) {
    %c0_i32 = arith.constant 0 : i32
    %c0_i32_0 = arith.constant 0 : i32
    %c0_i32_1 = arith.constant 0 : i32
    return %c0_i32, %c0_i32_0 : i32, i32
  }
  func.func @transform_3(%arg0: i32) -> (i32, i32) {
    %c0_i32 = arith.constant 0 : i32
    %c0_i32_0 = arith.constant 0 : i32
    return %arg0, %c0_i32 : i32, i32
  }
  func.func @transform_4(%arg0: i32) -> (i32, i32) {
    %c0_i32 = arith.constant 0 : i32
    %c0_i32_0 = arith.constant 0 : i32
    %c0_i32_1 = arith.constant 0 : i32
    return %c0_i32, %c0_i32_0 : i32, i32
  }
  func.func @transform_5(%arg0: i32) -> (i32, i32) {
    %c0_i32 = arith.constant 0 : i32
    %c0_i32_0 = arith.constant 0 : i32
    %c0_i32_1 = arith.constant 0 : i32
    return %c0_i32, %c0_i32_0 : i32, i32
  }
  func.func @transform_6(%arg0: i32) -> (i32, i32) {
    %c0_i32 = arith.constant 0 : i32
    %c0_i32_0 = arith.constant 0 : i32
    return %arg0, %c0_i32 : i32, i32
  }
  func.func @transform_7(%arg0: i32) -> (i32, i32) {
    %c0_i32 = arith.constant 0 : i32
    %c0_i32_0 = arith.constant 0 : i32
    return %arg0, %c0_i32 : i32, i32
  }
}

</mosaic_0001>

<bundles_post_ra>
// kernel: tpu_custom_call.1
= control target key start
LH: loop header
LB: loop body
LE: loop exit
PB: predicated region body
PF: predicated region fallthrough
CT: control target
= control target key end

     0   :  { %13 = vsyncpa [#allocation3], 0  ;;  %s457_s0 = inlined_call_operand.hbm [shape: f32[2,4,256], index: 0, kind: input, shape index: {}]   ;;  %s458_s1 = inlined_call_operand.hbm [shape: f32[4,128], index: 1, kind: input, shape index: {}]   ;;  %s459_s2 = inlined_call_operand.hbm [shape: f32[1,128], index: 2, kind: input, shape index: {}]   ;;  %s460_s3 = inlined_call_operand.vmem [shape: f32[2,8], index: 3, kind: input, shape index: {}]   ;;  %s461_s4 = inlined_call_operand.hbm [shape: f32[8,128], index: 4, kind: input, shape index: {}]   ;;  %s462_s5 = inlined_call_operand.vmem [shape: f32[1,128], index: 5, kind: input, shape index: {}]   ;;  %s463_s6 = inlined_call_operand.hbm [shape: f32[2,128], index: 6, kind: output, shape index: {0}]   ;;  %s464_s7 = inlined_call_operand.hbm [shape: f32[2,128], index: 7, kind: output, shape index: {1}]  }
   0x1   :  { %14 = vsyncpa [#allocation6], 0 }
   0x2   :  { %15 = vsyncpa [#allocation9], 0 }
   0x3   :  { %16 = vsyncpa [#allocation4], 0  ;;  %s36_s26 = sshll.u32 %s458_s1, 4  ;;  %s37_s26 = int_to_ptr.hbm [resolvable:$true] %s36_s26 }
   0x4   :  { %17 = vsyncpa [#allocation12], 0  ;;  %s385_s27 = smov [#allocation5]   ;;  %s22_s8 = sshll.u32 %s457_s0, 4  ;;  %s23_s8 = int_to_ptr.hbm [resolvable:$true] %s22_s8 }
   0x5   :  { %s38_s28 = sshll.u32 %s385_s27, 4  ;;  %s386_s9 = smov [#allocation2]   ;;  %s39_s28 = int_to_ptr.vmem [resolvable:$true] %s38_s28 }
   0x6   :  { %41 = dma.hbm_to_vmem [thread:$0]  %s37_s26, 64, %s39_s28, [#allocation6]  }
   0x7   :  { %s24_s10 = sshll.u32 %s386_s9, 4  ;;  %s387_s11 = smov 128   ;;  %s25_s10 = int_to_ptr.vmem [resolvable:$true] %s24_s10 }
   0x8   :  { %s388_s12 = smov 8   ;;  %s47_s1 = sshll.u32 %s459_s2, 4  ;;  %s48_s1 = int_to_ptr.hbm [resolvable:$true] %s47_s1 }
   0x9   :  { %30 = dma.hbm_to_vmem [thread:$0]  %s23_s8, 256, %s25_s10, [#allocation3], %s387_s11, %s387_s11, %s388_s12  }
   0xa   :  { %s389_s15 = smov [#allocation7]   ;;  %s60_s0 = sshll.u32 %s461_s4, 4  ;;  %s61_s0 = int_to_ptr.hbm [resolvable:$true] %s60_s0 }
   0xb   :  { %s49_s16 = sshll.u32 %s389_s15, 4  ;;  %s390_s19 = smov [#allocation8]   ;;  %s50_s16 = int_to_ptr.vmem [resolvable:$true] %s49_s16 }
   0xc   :  { %52 = dma.hbm_to_vmem [thread:$0]  %s48_s1, 16, %s50_s16, [#allocation6]  }
   0xd   :  { %s62_s20 = sshll.u32 %s390_s19, 4  ;;  %s63_s20 = int_to_ptr.vmem [resolvable:$true] %s62_s20 }
   0xe   :  { %65 = dma.hbm_to_vmem [thread:$0]  %s61_s0, 128, %s63_s20, [#allocation9]  }
   0xf   :  { %375 = dma.done.wait [#allocation3], 256  }
  0x10   :  { %376 = vsyncadd [#allocation3], 4294967040 }
  0x11   :  { %377 = dma.done.wait [#allocation6], 80  }
  0x12   :  { %378 = vsyncadd [#allocation6], 4294967216 }
  0x13   :  { %379 = dma.done.wait [#allocation9], 128  }
  0x14   :  { %380 = vsyncadd [#allocation9], 4294967168  ;;  %v84_v0 = vld [vmem:[#allocation2] sm:$0xff]  ;;  %v85_v1 = vld [vmem:[#allocation2 + $0x8] sm:$0xff]  ;;  %vm99_vm0 = vcmask 1043456   ;;  %vm158_vm1 = vcmask 64512   ;;  %v113_v16 = vlaneseq }
  0x15   :  { %88 = vst [vmem:[#allocation1] ss:$2 sm:$0xff] %v84_v0  ;;  %v110_v12 = vld [vmem:[#allocation5] sm:$0xf]  ;;  %v153_v13 = vld [vmem:[#allocation8] sm:$0xff]  ;;  %vm117_vm2 = vcmask 1041409  }
  0x16   :  { %92 = vst [vmem:[#allocation1 + $0x10] ss:$2 sm:$0xff] %v85_v1  ;;  %218 = vmatpush.msk.msra.mxu0 %vm99_vm0, %v110_v12  ;;  %v152_v14 = vld [vmem:[%s460_s3] sm:$0x3]  ;;  %177 = vmatpush.msra.mxu1 %v153_v13  ;;  %v114_v17 = vand.u32 127, %v113_v16  ;;  %vm119_vm3 = vcmask 31744  }
  0x17   :  { %220 = vmatmul.msk.f32.vlgmr.msra.gmra.mxu1 %vm158_vm1, %v152_v14  ;;  %s391_s21 = smov [#allocation11]   ;;  %s201_s25 = sshll.u32 %s464_s7, 4  ;;  %v230_v22 = vld [vmem:[%s462_s5] ss:$0 sm:$0xff]  ;;  %v229_v25 = vld [vmem:[#allocation7] ss:$0 sm:$0xff]  ;;  %s202_s25 = int_to_ptr.hbm [resolvable:$true] %s201_s25 }
  0x18   :  { %s199_s22 = sshll.u32 %s391_s21, 4  ;;  %s392_s27 = smov [#allocation10]   ;;  %s200_s22 = int_to_ptr.vmem [resolvable:$true] %s199_s22 }
  0x19   :  { %s188_s28 = sshll.u32 %s392_s27, 4  ;;  %s190_s8 = sshll.u32 %s463_s6, 4  ;;  %s189_s28 = int_to_ptr.vmem [resolvable:$true] %s188_s28  ;;  %s191_s8 = int_to_ptr.hbm [resolvable:$true] %s190_s8 }
  0x1c   :  { %v89_v2 = vld.sshfl [vmem:[#allocation1] sm:$0xff pattern:$0x75316420]  ;;  %v90_v3 = vld.sshfl [vmem:[#allocation1 + $0x8] sm:$0xff pattern:$0x75316420] }
  0x1d   :  { %v100_v4 = vsel %vm99_vm0, %v89_v2, 0.0  ;;  %v101_v5 = vsel %vm99_vm0, %v90_v3, 0.0  ;;  %v93_v7 = vld.sshfl [vmem:[#allocation1 + $0x10] sm:$0xff pattern:$0x75316420] }
  0x1e   :  { %v102_v6 = vadd.f32 %v101_v5, %v100_v4  ;;  %v94_v8 = vld.sshfl [vmem:[#allocation1 + $0x18] sm:$0xff pattern:$0x75316420]  ;;  %v105_v9 = vsel %vm99_vm0, %v93_v7, 0.0 }
  0x1f   :  { %v106_v10 = vsel %vm99_vm0, %v94_v8, 0.0 }
  0x20   :  { %103 = vadd.xlane.f32.xlu0 %v102_v6  ;;  %v107_v11 = vadd.f32 %v106_v10, %v105_v9 }
  0x28   :  { %108 = vadd.xlane.f32.xlu0 %v107_v11 }
  0x93   :  { %v104_v15 = vpop.xlane.xlu0 %103 }
  0x94   :  { %v115_v19 = vperm.slane %v104_v15, %v114_v17  ;;  %v179_v23 = vpop.f32.mrf.mxu1 }
  0x95   :  { %v180_v24 = vadd.f32 %v230_v22, %v179_v23 }
  0x97   :  { %182 = vst [vmem:[#allocation11] sm:$0x3] %v180_v24 }
  0x98   :  { %204 = dma.vmem_to_hbm [thread:$0]  %s200_s22, 32, %s202_s25, [#allocation12]  }
  0x9b   :  { %v109_v18 = vpop.xlane.xlu0 %108 }
  0x9c   :  { %v116_v20 = vperm.slane %v109_v18, %v114_v17 }
  0x9e   :  { %v118_v21 = vsel %vm117_vm2, %v116_v20, %v115_v19 }
  0x9f   :  { %219 = vmatmul.msk.f32.vlgmr.msra.gmra.mxu0 %vm119_vm3, %v118_v21 }
 0x11c   :  { %v142_v26 = vpop.f32.mrf.mxu0 }
 0x11d   :  { %v145_v27 = vmul.f32 0.00390625, %v142_v26 }
 0x11f   :  { %v150_v28 = vadd.f32 %v229_v25, %v145_v27 }
 0x121   :  { %151 = vst [vmem:[#allocation10] sm:$0x3] %v150_v28 }
 0x122   :  { %193 = dma.vmem_to_hbm [thread:$0]  %s189_s28, 32, %s191_s8, [#allocation4]  }
 0x123   :  { %381 = dma.done.wait [#allocation4], 32  }
 0x124   :  { %382 = vsyncadd [#allocation4], 4294967264 }
 0x125   :  { %383 = dma.done.wait [#allocation12], 32  }
 0x126   :  { %384 = vsyncadd [#allocation12], 4294967264 }
 0x127   :  { %213 = vsyncpa [#allocation3], 1 }
 0x128   :  { %214 = vsyncpa [#allocation6], 1 }
 0x129   :  { %215 = vsyncpa [#allocation9], 1 }
 0x12a   :  { %216 = vsyncpa [#allocation4], 1 }
 0x12b   :  { %217 = vsyncpa [#allocation12], 1 }

</bundles_post_ra>
